<compile_context>
chip_gen: v6e
topology: v6e:2x2x1
jax: 0.10.0
libtpu: 0.0.40
codegen_flags: <defaults>
</compile_context>

<pallas_src>
import functools

import jax
import jax.numpy as jnp
from jax import lax
from jax.experimental import pallas as pl
from jax.experimental.pallas import tpu as pltpu


def _round_up(a, m):
    return ((a + m - 1) // m) * m


def dense_kernel(x_ref, w_ref, b_ref, out_ref):
    """Fused MLP over one batch tile.

    x_ref  : (TB, P)   f32, zero-padded features           (P = 128-lane pad)
    w_ref  : (L, P, P) bf16 or f32, zero-padded per-layer weights
    b_ref  : (L, P)    f32, zero-padded per-layer biases
    out_ref: (TB, P)   f32, full-width (lane-dense) output
    """
    num_layers = w_ref.shape[0]
    tb = out_ref.shape[0]
    p = out_ref.shape[-1]
    cdt = w_ref.dtype  # matmul operand dtype (bf16 or f32)

    h = x_ref[...]  # f32 (TB, P)

    # Hidden layers: MXU matmul (bf16 operands, f32 accumulate), bias + ReLU
    # kept in f32 on the VPU. Unrolled at trace time.
    for l in range(num_layers - 1):
        z = jnp.dot(h.astype(cdt), w_ref[l], preferred_element_type=jnp.float32)
        h = jnp.maximum(z + b_ref[l:l + 1, :], 0.0)

    # Dropout: eval-mode identity (PyTorch nn.Dropout in eval() is a no-op).
    # TODO(synk): training-mode stochastic dropout would use pltpu.prng_* here.

    # Final linear layer (no ReLU).
    z = jnp.dot(h.astype(cdt), w_ref[num_layers - 1],
                preferred_element_type=jnp.float32)
    z = z + b_ref[num_layers - 1:num_layers, :]

    # log_softmax over columns 0:2, passthrough elsewhere — explicit column
    # arithmetic (no cross-lane reductions) + one full-width unmasked store.
    z0 = z[:, 0:1]
    z1 = z[:, 1:2]
    m = jnp.maximum(z0, z1)
    lse = jnp.log(jnp.exp(z0 - m) + jnp.exp(z1 - m))
    corr = m + lse                                        # (TB, 1)
    col = lax.broadcasted_iota(jnp.int32, (tb, p), 1)     # lane index
    out = z - jnp.where(col < 2, corr, 0.0)
    out_ref[...] = out.astype(out_ref.dtype)


def pack_params(params, in_dim, *, matmul_dtype=jnp.bfloat16):
    """Pack per-layer (W, b) into one (L, P, P) weight and (L, P) bias tensor.

    Zero padding to a common width P (multiple of 128 lanes) is numerically
    exact: padded bias entries are zero, so padded activation columns stay
    zero through matmul / bias / ReLU.  Call ONCE (not per forward pass).
    """
    num_layers = len(params)
    for w, b in params:
        assert b.size == w.shape[1], "bias must match layer output width"
    pad_w = max([in_dim] + [w.shape[1] for w, _ in params])
    pad_w = _round_up(pad_w, 128)   # native lane width / v5e MXU tile

    ws = [jnp.pad(w.astype(matmul_dtype),
                  ((0, pad_w - w.shape[0]), (0, pad_w - w.shape[1])))
          for w, _ in params]
    bs = [jnp.pad(b.reshape(-1).astype(jnp.float32), (0, pad_w - b.size))
          for _, b in params]
    w_packed = jnp.stack(ws)        # (L, P, P)
    b_packed = jnp.stack(bs)        # (L, P)
    return w_packed, b_packed


@functools.partial(jax.jit, static_argnames=("out_size", "tile_b"))
def dense_forward(x, w_packed, b_packed, *, out_size, tile_b=512):
    """Run the fused Dense forward. `w_packed`/`b_packed` from pack_params."""
    assert out_size >= 2, "log_softmax over columns 0:2 requires output_size >= 2"
    batch, in_dim = x.shape
    num_layers, pad_w, _ = w_packed.shape

    # Batch tiling: multiple of 8 sublanes; cap at ceil(batch/2) when possible
    # so v7x's two TensorCores each get >=1 "parallel" tile (no effect on
    # v5e/v6e which have 1 TC). Weights/biases use constant index_maps so they
    # stay VMEM-resident across the grid.
    padded_b = _round_up(batch, 8)
    tb = _round_up(min(tile_b, padded_b), 8)
    if padded_b >= 16:
        tb = min(tb, _round_up(pl.cdiv(padded_b, 2), 8))
    padded_b = _round_up(padded_b, tb)
    grid = (padded_b // tb,)

    x_p = x.astype(jnp.float32)
    if padded_b != batch or pad_w != in_dim:
        x_p = jnp.pad(x_p, ((0, padded_b - batch), (0, pad_w - in_dim)))

    # Lane-dense output: full pad_w-wide store in the kernel, slice here.
    out_padded = pl.pallas_call(
        dense_kernel,
        out_shape=jax.ShapeDtypeStruct((padded_b, pad_w), jnp.float32),
        grid=grid,
        in_specs=[
            pl.BlockSpec((tb, pad_w), lambda i: (i, 0)),
            pl.BlockSpec((num_layers, pad_w, pad_w), lambda i: (0, 0, 0)),
            pl.BlockSpec((num_layers, pad_w), lambda i: (0, 0)),
        ],
        out_specs=pl.BlockSpec((tb, pad_w), lambda i: (i, 0)),
        compiler_params=pltpu.CompilerParams(
            dimension_semantics=("parallel",)),
    )(x_p, w_packed, b_packed)

    return out_padded[:batch, :out_size]


def init_params(key, input_dim, hidden_units, num_layers, output_size):
    """Deterministic init mimicking nn.Linear's U(-1/sqrt(in), 1/sqrt(in))."""
    params = []
    in_size = input_dim
    units = hidden_units
    for _ in range(num_layers - 1):
        key, kw, kb = jax.random.split(key, 3)
        bound = 1.0 / jnp.sqrt(in_size)
        w = jax.random.uniform(kw, (in_size, units), jnp.float32, -bound, bound)
        b = jax.random.uniform(kb, (1, units), jnp.float32, -bound, bound)
        params.append((w, b))
        in_size = units
        units //= 2
    # fc_last
    key, kw, kb = jax.random.split(key, 3)
    bound = 1.0 / jnp.sqrt(in_size)
    w = jax.random.uniform(kw, (in_size, output_size), jnp.float32, -bound, bound)
    b = jax.random.uniform(kb, (1, output_size), jnp.float32, -bound, bound)
    params.append((w, b))
    return params


def dense_reference(x, params):
    """Pure-JAX reference for correctness checking."""
    h = x
    for w, b in params[:-1]:
        h = jnp.maximum(h @ w + b, 0.0)
    wl, bl = params[-1]
    z = h @ wl + bl
    ls = jax.nn.log_softmax(z[:, 0:2], axis=-1)
    return jnp.concatenate([ls, z[:, 2:]], axis=1)


if __name__ == "__main__":
    # Small shapes consistent with the module: batch=8, input_dim=32,
    # hidden_units=64 (-> hidden sizes 64, 32, 16, 8), output_size=5.
    batch = 8
    input_dim = 32
    hidden_units = 64
    num_layers = 5
    output_size = 5

    key = jax.random.PRNGKey(0)
    key, kx = jax.random.split(key)
    x = jax.random.normal(kx, (batch, input_dim), jnp.float32)
    params = init_params(key, input_dim, hidden_units, num_layers, output_size)

    ref = dense_reference(x, params)

    # f32 matmul path: strict match against the pure-JAX reference.
    w_f32, b_f32 = pack_params(params, input_dim, matmul_dtype=jnp.float32)
    out = jax.block_until_ready(
        dense_forward(x, w_f32, b_f32, out_size=output_size))
    assert out.shape == (batch, output_size), out.shape
    assert jnp.allclose(out, ref, atol=1e-5, rtol=1e-5), (out, ref)

    # Default bf16 matmul-operand path (MXU-native on v5e/v6e/v7x);
    # elementwise stays f32, so only matmul rounding differs.
    w_bf16, b_bf16 = pack_params(params, input_dim)   # bf16 default
    out_bf16 = jax.block_until_ready(
        dense_forward(x, w_bf16, b_bf16, out_size=output_size))
    assert out_bf16.shape == (batch, output_size), out_bf16.shape
    assert jnp.allclose(out_bf16, ref, atol=5e-2, rtol=5e-2), (out_bf16, ref)

    print("KERNEL_OK")
</pallas_src>

<mosaic_0001>
module attributes {stable_mosaic.version = 11 : i64} {
  func.func @dense_kernel(%arg0: i32, %arg1: memref<8x128xf32, #tpu.memory_space<vmem>>, %arg2: memref<5x128x128xf32, #tpu.memory_space<vmem>>, %arg3: memref<5x128xf32, #tpu.memory_space<vmem>>, %arg4: memref<8x128xf32, #tpu.memory_space<vmem>>) attributes {dimension_semantics = [#tpu.dimension_semantics<parallel>], iteration_bounds = array<i64: 1>, scalar_prefetch = 0 : i64, scratch_operands = 0 : i64, tpu.core_type = #tpu.core_type<tc>, window_params = [{transform_indices = @transform_0, window_bounds = array<i64: 8, 128>}, {pipeline_mode = #tpu.pipeline_mode<synchronous>, transform_indices = @transform_1, window_bounds = array<i64: 5, 128, 128>}, {pipeline_mode = #tpu.pipeline_mode<synchronous>, transform_indices = @transform_2, window_bounds = array<i64: 5, 128>}, {transform_indices = @transform_3, window_bounds = array<i64: 8, 128>}]} {
    %c0 = arith.constant 0 : index
    %c0_0 = arith.constant 0 : index
    %0 = vector.load %arg1[%c0, %c0_0] : memref<8x128xf32, #tpu.memory_space<vmem>>, vector<8x128xf32>
    %c0_1 = arith.constant 0 : index
    %c0_2 = arith.constant 0 : index
    %c0_3 = arith.constant 0 : index
    %1 = vector.load %arg2[%c0_1, %c0_2, %c0_3] : memref<5x128x128xf32, #tpu.memory_space<vmem>>, vector<1x128x128xf32>
    %2 = vector.shape_cast %1 : vector<1x128x128xf32> to vector<128x128xf32>
    %cst = arith.constant dense<0.000000e+00> : vector<8x128xf32>
    %3 = tpu.matmul %0, %2, %cst {dimension_numbers = #tpu.dot_dimension_numbers<[1], [0], [0], [1], [0, 0, 1, 1], [], []>} : vector<8x128xf32>, vector<128x128xf32>, vector<8x128xf32> -> vector<8x128xf32>
    %c0_4 = arith.constant 0 : index
    %c0_5 = arith.constant 0 : index
    %4 = vector.load %arg3[%c0_4, %c0_5] : memref<5x128xf32, #tpu.memory_space<vmem>>, vector<1x128xf32>
    %5 = vector.broadcast %4 : vector<1x128xf32> to vector<8x128xf32>
    %6 = arith.addf %3, %5 : vector<8x128xf32>
    %cst_6 = arith.constant 0.000000e+00 : f32
    %7 = vector.broadcast %cst_6 : f32 to vector<8x128xf32>
    %8 = arith.maximumf %6, %7 : vector<8x128xf32>
    %c1 = arith.constant 1 : index
    %c0_7 = arith.constant 0 : index
    %c0_8 = arith.constant 0 : index
    %9 = vector.load %arg2[%c1, %c0_7, %c0_8] : memref<5x128x128xf32, #tpu.memory_space<vmem>>, vector<1x128x128xf32>
    %10 = vector.shape_cast %9 : vector<1x128x128xf32> to vector<128x128xf32>
    %cst_9 = arith.constant dense<0.000000e+00> : vector<8x128xf32>
    %11 = tpu.matmul %8, %10, %cst_9 {dimension_numbers = #tpu.dot_dimension_numbers<[1], [0], [0], [1], [0, 0, 1, 1], [], []>} : vector<8x128xf32>, vector<128x128xf32>, vector<8x128xf32> -> vector<8x128xf32>
    %c1_10 = arith.constant 1 : index
    %c0_11 = arith.constant 0 : index
    %12 = vector.load %arg3[%c1_10, %c0_11] : memref<5x128xf32, #tpu.memory_space<vmem>>, vector<1x128xf32>
    %13 = vector.broadcast %12 : vector<1x128xf32> to vector<8x128xf32>
    %14 = arith.addf %11, %13 : vector<8x128xf32>
    %cst_12 = arith.constant 0.000000e+00 : f32
    %15 = vector.broadcast %cst_12 : f32 to vector<8x128xf32>
    %16 = arith.maximumf %14, %15 : vector<8x128xf32>
    %c2 = arith.constant 2 : index
    %c0_13 = arith.constant 0 : index
    %c0_14 = arith.constant 0 : index
    %17 = vector.load %arg2[%c2, %c0_13, %c0_14] : memref<5x128x128xf32, #tpu.memory_space<vmem>>, vector<1x128x128xf32>
    %18 = vector.shape_cast %17 : vector<1x128x128xf32> to vector<128x128xf32>
    %cst_15 = arith.constant dense<0.000000e+00> : vector<8x128xf32>
    %19 = tpu.matmul %16, %18, %cst_15 {dimension_numbers = #tpu.dot_dimension_numbers<[1], [0], [0], [1], [0, 0, 1, 1], [], []>} : vector<8x128xf32>, vector<128x128xf32>, vector<8x128xf32> -> vector<8x128xf32>
    %c2_16 = arith.constant 2 : index
    %c0_17 = arith.constant 0 : index
    %20 = vector.load %arg3[%c2_16, %c0_17] : memref<5x128xf32, #tpu.memory_space<vmem>>, vector<1x128xf32>
    %21 = vector.broadcast %20 : vector<1x128xf32> to vector<8x128xf32>
    %22 = arith.addf %19, %21 : vector<8x128xf32>
    %cst_18 = arith.constant 0.000000e+00 : f32
    %23 = vector.broadcast %cst_18 : f32 to vector<8x128xf32>
    %24 = arith.maximumf %22, %23 : vector<8x128xf32>
    %c3 = arith.constant 3 : index
    %c0_19 = arith.constant 0 : index
    %c0_20 = arith.constant 0 : index
    %25 = vector.load %arg2[%c3, %c0_19, %c0_20] : memref<5x128x128xf32, #tpu.memory_space<vmem>>, vector<1x128x128xf32>
    %26 = vector.shape_cast %25 : vector<1x128x128xf32> to vector<128x128xf32>
    %cst_21 = arith.constant dense<0.000000e+00> : vector<8x128xf32>
    %27 = tpu.matmul %24, %26, %cst_21 {dimension_numbers = #tpu.dot_dimension_numbers<[1], [0], [0], [1], [0, 0, 1, 1], [], []>} : vector<8x128xf32>, vector<128x128xf32>, vector<8x128xf32> -> vector<8x128xf32>
    %c3_22 = arith.constant 3 : index
    %c0_23 = arith.constant 0 : index
    %28 = vector.load %arg3[%c3_22, %c0_23] : memref<5x128xf32, #tpu.memory_space<vmem>>, vector<1x128xf32>
    %29 = vector.broadcast %28 : vector<1x128xf32> to vector<8x128xf32>
    %30 = arith.addf %27, %29 : vector<8x128xf32>
    %cst_24 = arith.constant 0.000000e+00 : f32
    %31 = vector.broadcast %cst_24 : f32 to vector<8x128xf32>
    %32 = arith.maximumf %30, %31 : vector<8x128xf32>
    %c4 = arith.constant 4 : index
    %c0_25 = arith.constant 0 : index
    %c0_26 = arith.constant 0 : index
    %33 = vector.load %arg2[%c4, %c0_25, %c0_26] : memref<5x128x128xf32, #tpu.memory_space<vmem>>, vector<1x128x128xf32>
    %34 = vector.shape_cast %33 : vector<1x128x128xf32> to vector<128x128xf32>
    %cst_27 = arith.constant dense<0.000000e+00> : vector<8x128xf32>
    %35 = tpu.matmul %32, %34, %cst_27 {dimension_numbers = #tpu.dot_dimension_numbers<[1], [0], [0], [1], [0, 0, 1, 1], [], []>} : vector<8x128xf32>, vector<128x128xf32>, vector<8x128xf32> -> vector<8x128xf32>
    %c4_28 = arith.constant 4 : index
    %c0_29 = arith.constant 0 : index
    %36 = vector.load %arg3[%c4_28, %c0_29] : memref<5x128xf32, #tpu.memory_space<vmem>>, vector<1x128xf32>
    %37 = vector.broadcast %36 : vector<1x128xf32> to vector<8x128xf32>
    %38 = arith.addf %35, %37 : vector<8x128xf32>
    %39 = vector.extract_strided_slice %38 {offsets = [0, 0], sizes = [8, 1], strides = [1, 1]} : vector<8x128xf32> to vector<8x1xf32>
    %40 = vector.extract_strided_slice %38 {offsets = [0, 1], sizes = [8, 1], strides = [1, 1]} : vector<8x128xf32> to vector<8x1xf32>
    %41 = arith.maximumf %39, %40 : vector<8x1xf32>
    %42 = arith.subf %39, %41 : vector<8x1xf32>
    %43 = math.exp %42 : vector<8x1xf32>
    %44 = arith.subf %40, %41 : vector<8x1xf32>
    %45 = math.exp %44 : vector<8x1xf32>
    %46 = arith.addf %43, %45 : vector<8x1xf32>
    %47 = math.log %46 : vector<8x1xf32>
    %48 = arith.addf %41, %47 : vector<8x1xf32>
    %49 = tpu.iota {dimensions = array<i32: 1>} : vector<8x128xi32>
    %c2_i32 = arith.constant 2 : i32
    %50 = vector.broadcast %c2_i32 : i32 to vector<8x128xi32>
    %51 = arith.cmpi slt, %49, %50 : vector<8x128xi32>
    %cst_30 = arith.constant 0.000000e+00 : f32
    %52 = vector.shape_cast %48 : vector<8x1xf32> to vector<8x1xf32>
    %53 = vector.broadcast %52 : vector<8x1xf32> to vector<8x128xf32>
    %54 = vector.broadcast %cst_30 : f32 to vector<8x128xf32>
    %55 = arith.select %51, %53, %54 : vector<8x128xi1>, vector<8x128xf32>
    %56 = arith.subf %38, %55 : vector<8x128xf32>
    %c0_31 = arith.constant 0 : index
    %c0_32 = arith.constant 0 : index
    %57 = vector.load %arg4[%c0_31, %c0_32] : memref<8x128xf32, #tpu.memory_space<vmem>>, vector<8x128xf32>
    tpu.vector_store %arg4[%c0_31, %c0_32], %56 {strides = array<i32>} : memref<8x128xf32, #tpu.memory_space<vmem>>, vector<8x128xf32>,
    return
  }
  func.func @transform_0(%arg0: i32) -> (i32, i32) {
    %c0_i32 = arith.constant 0 : i32
    %c0_i32_0 = arith.constant 0 : i32
    return %arg0, %c0_i32 : i32, i32
  }
  func.func @transform_1(%arg0: i32) -> (i32, i32, i32) {
    %c0_i32 = arith.constant 0 : i32
    %c0_i32_0 = arith.constant 0 : i32
    %c0_i32_1 = arith.constant 0 : i32
    %c0_i32_2 = arith.constant 0 : i32
    return %c0_i32, %c0_i32_0, %c0_i32_1 : i32, i32, i32
  }
  func.func @transform_2(%arg0: i32) -> (i32, i32) {
    %c0_i32 = arith.constant 0 : i32
    %c0_i32_0 = arith.constant 0 : i32
    %c0_i32_1 = arith.constant 0 : i32
    return %c0_i32, %c0_i32_0 : i32, i32
  }
  func.func @transform_3(%arg0: i32) -> (i32, i32) {
    %c0_i32 = arith.constant 0 : i32
    %c0_i32_0 = arith.constant 0 : i32
    return %arg0, %c0_i32 : i32, i32
  }
}

</mosaic_0001>

<bundles_post_ra>
// kernel: dense_forward.1
= control target key start
LH: loop header
LB: loop body
LE: loop exit
PB: predicated region body
PF: predicated region fallthrough
CT: control target
= control target key end

     0   :  { %8 = vsyncpa [#allocation3], 0  ;;  %s1011_s0 = inlined_call_operand.vmem [shape: f32[8,128], index: 0, kind: input, shape index: {}]   ;;  %s1012_s1 = inlined_call_operand.hbm [shape: f32[5,128,128], index: 1, kind: input, shape index: {}]   ;;  %s1013_s2 = inlined_call_operand.vmem [shape: f32[5,128], index: 2, kind: input, shape index: {}]   ;;  %s1014_s3 = inlined_call_operand.hbm [shape: f32[8,128], index: 3, kind: output, shape index: {}]  }
   0x1   :  { %9 = vsyncpa [#allocation4], 0  ;;  %s868_s12 = smov [#allocation2]  }
   0x2   :  { %s17_s13 = sshll.u32 %s868_s12, 4  ;;  %s18_s13 = int_to_ptr.vmem [resolvable:$true] %s17_s13 }
   0x3   :  { %s832_s14 = scalar_lea.vmem %s18_s13, 10240  ;;  %p837_p1 = scmp.lt.s32.totalorder %s18_s13, %s18_s13 }
   0x4   :  { %p833_p0 = scmp.ne.s32.totalorder %s18_s13, %s832_s14  ;;  %p838_p2 = scmp.lt.s32.totalorder %s832_s14, %s832_s14 }
   0x6   :  { %p839_p3 = por %p838_p2, %p837_p1 }
   0x8   :  { %p840_p4 = pnand %p839_p3, %p833_p0 }
   0xa   :  { %843 = shalt.err (!%p840_p4)
}
   0xb   :  { %s869_s15 = smov 128   ;;  %s870_s16 = smov 8  }
   0xc   :  { %23 = dma.hbm_to_vmem [thread:$0]  %s1012_s1, 10240, %s18_s13, [#allocation3], %s869_s15, %s869_s15, %s870_s16  }
   0xd   :  { %864 = dma.done.wait [#allocation3], 10240  }
   0xe   :  { %865 = vsyncadd [#allocation3], 4294957056  ;;  %v871_v0 = vmov 0.0   ;;  %vm872_vm0 = vmmov 0   ;;  %v45_v1 = vld [vmem:[#allocation2 + $0x78] sm:$0xff]  ;;  %v44_v2 = vld [vmem:[#allocation2 + $0x70] sm:$0xff] }
   0xf   :  { %632 = vmatprep.subr.mxu0 %v871_v0  ;;  %664 = vmatprep.mubr.msk.f32.mxu0 %vm872_vm0, %v871_v0  ;;  %v43_v3 = vld [vmem:[#allocation2 + $0x68] sm:$0xff]  ;;  %v42_v4 = vld [vmem:[#allocation2 + $0x60] sm:$0xff]  ;;  %v138_v5 = vld [vmem:[#allocation2 + $0xf8] sm:$0xff]  ;;  %s873_s29 = smov 127   ;;  %s874_s30 = smov 1  }
  0x10   :  { %667 = vmatprep.subr.mxu1 %v871_v0  ;;  %699 = vmatprep.mubr.msk.f32.mxu1 %vm872_vm0, %v871_v0  ;;  %v41_v6 = vld [vmem:[#allocation2 + $0x58] sm:$0xff]  ;;  %v137_v7 = vld [vmem:[#allocation2 + $0xf0] sm:$0xff]  ;;  %v136_v8 = vld [vmem:[#allocation2 + $0xe8] sm:$0xff] }
  0x11   :  { %633 = vmatpush3.msra.mxu0 %v45_v1  ;;  %668 = vmatpush3.msra.mxu1 %v138_v5  ;;  %v40_v9 = vld [vmem:[#allocation2 + $0x50] sm:$0xff]  ;;  %v135_v10 = vld [vmem:[#allocation2 + $0xe0] sm:$0xff]  ;;  %v39_v11 = vld [vmem:[#allocation2 + $0x48] sm:$0xff] }
  0x12   :  { %634 = vmatprep.subr.mxu0 %v871_v0  ;;  %669 = vmatprep.subr.mxu1 %v871_v0  ;;  %v134_v12 = vld [vmem:[#allocation2 + $0xd8] sm:$0xff]  ;;  %v38_v13 = vld [vmem:[#allocation2 + $0x40] sm:$0xff]  ;;  %v133_v14 = vld [vmem:[#allocation2 + $0xd0] sm:$0xff] }
  0x13   :  { %635 = vmatpush3.msra.mxu0 %v44_v2  ;;  %670 = vmatpush3.msra.mxu1 %v137_v7  ;;  %v37_v15 = vld [vmem:[#allocation2 + $0x38] sm:$0xff]  ;;  %v132_v16 = vld [vmem:[#allocation2 + $0xc8] sm:$0xff]  ;;  %v36_v17 = vld [vmem:[#allocation2 + $0x30] sm:$0xff] }
  0x14   :  { %636 = vmatprep.subr.mxu0 %v871_v0  ;;  %671 = vmatprep.subr.mxu1 %v871_v0  ;;  %v131_v18 = vld [vmem:[#allocation2 + $0xc0] sm:$0xff]  ;;  %v35_v19 = vld [vmem:[#allocation2 + $0x28] sm:$0xff]  ;;  %v130_v20 = vld [vmem:[#allocation2 + $0xb8] sm:$0xff] }
  0x15   :  { %637 = vmatpush3.msra.mxu0 %v43_v3  ;;  %672 = vmatpush3.msra.mxu1 %v136_v8  ;;  %v34_v21 = vld [vmem:[#allocation2 + $0x20] sm:$0xff]  ;;  %v129_v22 = vld [vmem:[#allocation2 + $0xb0] sm:$0xff]  ;;  %v33_v23 = vld [vmem:[#allocation2 + $0x18] sm:$0xff] }
  0x16   :  { %638 = vmatprep.subr.mxu0 %v871_v0  ;;  %673 = vmatprep.subr.mxu1 %v871_v0  ;;  %v128_v24 = vld [vmem:[#allocation2 + $0xa8] sm:$0xff]  ;;  %v32_v25 = vld [vmem:[#allocation2 + $0x10] sm:$0xff]  ;;  %v127_v26 = vld [vmem:[#allocation2 + $0xa0] sm:$0xff] }
  0x17   :  { %639 = vmatpush3.msra.mxu0 %v42_v4  ;;  %674 = vmatpush3.msra.mxu1 %v135_v10  ;;  %v31_v27 = vld [vmem:[#allocation2 + $0x8] sm:$0xff]  ;;  %v126_v28 = vld [vmem:[#allocation2 + $0x98] sm:$0xff]  ;;  %v30_v29 = vld [vmem:[#allocation2] sm:$0xff] }
  0x18   :  { %640 = vmatprep.subr.mxu0 %v871_v0  ;;  %675 = vmatprep.subr.mxu1 %v871_v0  ;;  %v29_v30 = vld [vmem:[%s1011_s0] sm:$0xff]  ;;  %v125_v31 = vld [vmem:[#allocation2 + $0x90] sm:$0xff]  ;;  %v124_v32 = vld [vmem:[#allocation2 + $0x88] sm:$0xff] }
  0x19   :  { %641 = vmatpush3.msra.mxu0 %v41_v6  ;;  %676 = vmatpush3.msra.mxu1 %v134_v12  ;;  %v123_v33 = vld [vmem:[#allocation2 + $0x80] sm:$0xff]  ;;  %v231_v34 = vld [vmem:[#allocation2 + $0x178] sm:$0xff]  ;;  %v230_v35 = vld [vmem:[#allocation2 + $0x170] sm:$0xff] }
  0x1a   :  { %642 = vmatprep.subr.mxu0 %v871_v0  ;;  %677 = vmatprep.subr.mxu1 %v871_v0  ;;  %v229_v36 = vld [vmem:[#allocation2 + $0x168] sm:$0xff]  ;;  %v228_v37 = vld [vmem:[#allocation2 + $0x160] sm:$0xff]  ;;  %v227_v38 = vld [vmem:[#allocation2 + $0x158] sm:$0xff] }
  0x1b   :  { %643 = vmatpush3.msra.mxu0 %v40_v9  ;;  %678 = vmatpush3.msra.mxu1 %v133_v14  ;;  %v226_v39 = vld [vmem:[#allocation2 + $0x150] sm:$0xff]  ;;  %v225_v40 = vld [vmem:[#allocation2 + $0x148] sm:$0xff]  ;;  %v224_v41 = vld [vmem:[#allocation2 + $0x140] sm:$0xff] }
  0x1c   :  { %644 = vmatprep.subr.mxu0 %v871_v0  ;;  %679 = vmatprep.subr.mxu1 %v871_v0  ;;  %v223_v42 = vld [vmem:[#allocation2 + $0x138] sm:$0xff]  ;;  %v222_v43 = vld [vmem:[#allocation2 + $0x130] sm:$0xff]  ;;  %v221_v44 = vld [vmem:[#allocation2 + $0x128] sm:$0xff] }
  0x1d   :  { %645 = vmatpush3.msra.mxu0 %v39_v11  ;;  %680 = vmatpush3.msra.mxu1 %v132_v16  ;;  %v220_v45 = vld [vmem:[#allocation2 + $0x120] sm:$0xff]  ;;  %v219_v46 = vld [vmem:[#allocation2 + $0x118] sm:$0xff]  ;;  %v218_v52 = vld [vmem:[#allocation2 + $0x110] sm:$0xff] }
  0x1e   :  { %646 = vmatprep.subr.mxu0 %v871_v0  ;;  %681 = vmatprep.subr.mxu1 %v871_v0  ;;  %v542_v47 = vld [vmem:[%s1013_s2] ss:$0 sm:$0xff]  ;;  %v217_v53 = vld [vmem:[#allocation2 + $0x108] sm:$0xff]  ;;  %v324_v55 = vld [vmem:[#allocation2 + $0x1f8] sm:$0xff] }
  0x1f   :  { %647 = vmatpush3.msra.mxu0 %v38_v13  ;;  %682 = vmatpush3.msra.mxu1 %v131_v18  ;;  %v216_v54 = vld [vmem:[#allocation2 + $0x100] sm:$0xff]  ;;  %v323_v56 = vld [vmem:[#allocation2 + $0x1f0] sm:$0xff]  ;;  %v322_v57 = vld [vmem:[#allocation2 + $0x1e8] sm:$0xff] }
  0x20   :  { %648 = vmatprep.subr.mxu0 %v871_v0  ;;  %683 = vmatprep.subr.mxu1 %v871_v0  ;;  %v321_v58 = vld [vmem:[#allocation2 + $0x1e0] sm:$0xff]  ;;  %v320_v59 = vld [vmem:[#allocation2 + $0x1d8] sm:$0xff]  ;;  %v319_v60 = vld [vmem:[#allocation2 + $0x1d0] sm:$0xff] }
  0x21   :  { %649 = vmatpush3.msra.mxu0 %v37_v15  ;;  %684 = vmatpush3.msra.mxu1 %v130_v20  ;;  %v318_v61 = vld [vmem:[#allocation2 + $0x1c8] sm:$0xff]  ;;  %v317_v62 = vld [vmem:[#allocation2 + $0x1c0] sm:$0xff]  ;;  %v316_v63 = vld [vmem:[#allocation2 + $0x1b8] sm:$0xff] }
  0x22   :  { %650 = vmatprep.subr.mxu0 %v871_v0  ;;  %685 = vmatprep.subr.mxu1 %v871_v0  ;;  %v315_v1 = vld [vmem:[#allocation2 + $0x1b0] sm:$0xff]  ;;  %v314_v2 = vld [vmem:[#allocation2 + $0x1a8] sm:$0xff]  ;;  %v313_v3 = vld [vmem:[#allocation2 + $0x1a0] sm:$0xff] }
  0x23   :  { %651 = vmatpush3.msra.mxu0 %v36_v17  ;;  %686 = vmatpush3.msra.mxu1 %v129_v22  ;;  %v312_v4 = vld [vmem:[#allocation2 + $0x198] sm:$0xff]  ;;  %v543_v5 = vld [vmem:[%s1013_s2 + $0x1] ss:$0 sm:$0xff]  ;;  %v311_v10 = vld [vmem:[#allocation2 + $0x190] sm:$0xff] }
  0x24   :  { %652 = vmatprep.subr.mxu0 %v871_v0  ;;  %687 = vmatprep.subr.mxu1 %v871_v0  ;;  %v310_v11 = vld [vmem:[#allocation2 + $0x188] sm:$0xff]  ;;  %v309_v12 = vld [vmem:[#allocation2 + $0x180] sm:$0xff]  ;;  %v417_v13 = vld [vmem:[#allocation2 + $0x278] sm:$0xff] }
  0x25   :  { %653 = vmatpush3.msra.mxu0 %v35_v19  ;;  %688 = vmatpush3.msra.mxu1 %v128_v24  ;;  %v416_v14 = vld [vmem:[#allocation2 + $0x270] sm:$0xff]  ;;  %v415_v15 = vld [vmem:[#allocation2 + $0x268] sm:$0xff]  ;;  %v414_v16 = vld [vmem:[#allocation2 + $0x260] sm:$0xff] }
  0x26   :  { %654 = vmatprep.subr.mxu0 %v871_v0  ;;  %689 = vmatprep.subr.mxu1 %v871_v0  ;;  %v413_v17 = vld [vmem:[#allocation2 + $0x258] sm:$0xff]  ;;  %v412_v18 = vld [vmem:[#allocation2 + $0x250] sm:$0xff]  ;;  %v411_v19 = vld [vmem:[#allocation2 + $0x248] sm:$0xff] }
  0x27   :  { %655 = vmatpush3.msra.mxu0 %v34_v21  ;;  %690 = vmatpush3.msra.mxu1 %v127_v26  ;;  %v410_v20 = vld [vmem:[#allocation2 + $0x240] sm:$0xff]  ;;  %v409_v21 = vld [vmem:[#allocation2 + $0x238] sm:$0xff]  ;;  %v408_v22 = vld [vmem:[#allocation2 + $0x230] sm:$0xff] }
  0x28   :  { %656 = vmatprep.subr.mxu0 %v871_v0  ;;  %691 = vmatprep.subr.mxu1 %v871_v0  ;;  %v406_v24 = vld [vmem:[#allocation2 + $0x220] sm:$0xff] }
  0x29   :  { %657 = vmatpush3.msra.mxu0 %v33_v23  ;;  %692 = vmatpush3.msra.mxu1 %v126_v28  ;;  %v407_v23 = vld [vmem:[#allocation2 + $0x228] sm:$0xff]  ;;  %v544_v26 = vld [vmem:[%s1013_s2 + $0x2] ss:$0 sm:$0xff] }
  0x2a   :  { %658 = vmatprep.subr.mxu0 %v871_v0  ;;  %693 = vmatprep.subr.mxu1 %v871_v0 }
  0x2b   :  { %659 = vmatpush3.msra.mxu0 %v32_v25  ;;  %694 = vmatpush3.msra.mxu1 %v125_v31  ;;  %v405_v25 = vld [vmem:[#allocation2 + $0x218] sm:$0xff]  ;;  %v404_v31 = vld [vmem:[#allocation2 + $0x210] sm:$0xff] }
  0x2c   :  { %660 = vmatprep.subr.mxu0 %v871_v0  ;;  %695 = vmatprep.subr.mxu1 %v871_v0 }
  0x2d   :  { %661 = vmatpush3.msra.mxu0 %v31_v27  ;;  %696 = vmatpush3.msra.mxu1 %v124_v32  ;;  %v403_v32 = vld [vmem:[#allocation2 + $0x208] sm:$0xff] }
  0x2e   :  { %662 = vmatprep.subr.mxu0 %v871_v0  ;;  %697 = vmatprep.subr.mxu1 %v871_v0 }
  0x2f   :  { %663 = vmatpush3.msra.mxu0 %v30_v29  ;;  %698 = vmatpush3.msra.mxu1 %v123_v33  ;;  %v402_v33 = vld [vmem:[#allocation2 + $0x200] sm:$0xff] }
  0x30   :  { %665 = vmatmul.mubr.f32.vlgmr.msra.gmra.mxu0 %v29_v30  ;;  %702 = vmatprep.subr.mxu0 %v871_v0 }
  0x31   :  { %734 = vmatprep.mubr.msk.f32.mxu0 %vm872_vm0, %v871_v0  ;;  %737 = vmatprep.subr.mxu1 %v871_v0 }
  0x32   :  { %703 = vmatpush3.msra.mxu0 %v231_v34  ;;  %v545_v34 = vld [vmem:[%s1013_s2 + $0x3] ss:$0 sm:$0xff] }
  0x33   :  { %704 = vmatprep.subr.mxu0 %v871_v0 }
  0x34   :  { %705 = vmatpush3.msra.mxu0 %v230_v35 }
  0x35   :  { %706 = vmatprep.subr.mxu0 %v871_v0 }
  0x36   :  { %707 = vmatpush3.msra.mxu0 %v229_v36 }
  0x37   :  { %708 = vmatprep.subr.mxu0 %v871_v0 }
  0x38   :  { %709 = vmatpush3.msra.mxu0 %v228_v37 }
  0x39   :  { %710 = vmatprep.subr.mxu0 %v871_v0 }
  0x3a   :  { %711 = vmatpush3.msra.mxu0 %v227_v38 }
  0x3b   :  { %712 = vmatprep.subr.mxu0 %v871_v0 }
  0x3c   :  { %713 = vmatpush3.msra.mxu0 %v226_v39  ;;  %v546_v39 = vld [vmem:[%s1013_s2 + $0x4] ss:$0 sm:$0xff]  ;;  %s876_s2 = smov [#allocation5]  }
  0x3d   :  { %714 = vmatprep.subr.mxu0 %v871_v0  ;;  %s533_s4 = sshll.u32 %s876_s2, 4  ;;  %s534_s4 = int_to_ptr.vmem [resolvable:$true] %s533_s4 }
  0x3e   :  { %715 = vmatpush3.msra.mxu0 %v225_v40  ;;  %s844_s5 = scalar_lea.vmem %s534_s4, 128  ;;  %p849_p6 = scmp.lt.s32.totalorder %s534_s4, %s534_s4 }
  0x3f   :  { %716 = vmatprep.subr.mxu0 %v871_v0  ;;  %p845_p5 = scmp.ne.s32.totalorder %s534_s4, %s844_s5  ;;  %p850_p7 = scmp.lt.s32.totalorder %s844_s5, %s844_s5 }
  0x40   :  { %717 = vmatpush3.msra.mxu0 %v224_v41 }
  0x41   :  { %718 = vmatprep.subr.mxu0 %v871_v0  ;;  %p851_p8 = por %p850_p7, %p849_p6 }
  0x42   :  { %719 = vmatpush3.msra.mxu0 %v223_v42 }
  0x43   :  { %720 = vmatprep.subr.mxu0 %v871_v0  ;;  %p852_p9 = pnand %p851_p8, %p845_p5 }
  0x44   :  { %721 = vmatpush3.msra.mxu0 %v222_v43 }
  0x45   :  { %722 = vmatprep.subr.mxu0 %v871_v0 }
  0x46   :  { %723 = vmatpush3.msra.mxu0 %v221_v44 }
  0x47   :  { %724 = vmatprep.subr.mxu0 %v871_v0 }
  0x48   :  { %725 = vmatpush3.msra.mxu0 %v220_v45 }
  0x49   :  { %726 = vmatprep.subr.mxu0 %v871_v0 }
  0x4a   :  { %727 = vmatpush3.msra.mxu0 %v219_v46 }
  0x4b   :  { %728 = vmatprep.subr.mxu0 %v871_v0 }
  0x4c   :  { %729 = vmatpush3.msra.mxu0 %v218_v52 }
  0x4d   :  { %730 = vmatprep.subr.mxu0 %v871_v0 }
  0x4e   :  { %731 = vmatpush3.msra.mxu0 %v217_v53 }
  0x4f   :  { %732 = vmatprep.subr.mxu0 %v871_v0 }
  0x50   :  { %733 = vmatpush3.msra.mxu0 %v216_v54 }
  0x51   :  { %772 = vmatprep.subr.mxu0 %v871_v0 }
  0xf0   :  { %v117_v48 = vpop.f32.mrf.mxu0 }
  0xf1   :  { %v118_v49 = vadd.f32 %v542_v47, %v117_v48  ;;  %v875_v48 = vmov 0  }
  0xf2   :  { %v666_v50 = vpop.f32.mrf.mxu0  ;;  %816 = vset.pattern.permute.xlu1 %v875_v48  ;;  %817 = vset.pattern.permute.xlu0 %v875_v48 }
  0xf3   :  { %v121_v51 = vmax.f32 %v118_v49, 0.0 }
  0xf5   :  { %700 = vmatmul.mubr.f32.vlgmr.msra.gmra.mxu1 %v121_v51 }
  0xf6   :  { %769 = vmatprep.mubr.msk.f32.mxu1 %vm872_vm0, %v871_v0  ;;  %738 = vmatpush3.msra.mxu1 %v324_v55 }
  0xf7   :  { %739 = vmatprep.subr.mxu1 %v871_v0 }
  0xf8   :  { %740 = vmatpush3.msra.mxu1 %v323_v56 }
  0xf9   :  { %741 = vmatprep.subr.mxu1 %v871_v0 }
  0xfa   :  { %742 = vmatpush3.msra.mxu1 %v322_v57  ;;  %v516_v57 = vlaneseq }
  0xfb   :  { %743 = vmatprep.subr.mxu1 %v871_v0 }
  0xfc   :  { %744 = vmatpush3.msra.mxu1 %v321_v58  ;;  %v517_v58 = vand.u32 127, %v516_v57 }
  0xfd   :  { %745 = vmatprep.subr.mxu1 %v871_v0 }
  0xfe   :  { %746 = vmatpush3.msra.mxu1 %v320_v59  ;;  %vm518_vm1 = vcmp.lt.s32.totalorder %v517_v58, 2 }
  0xff   :  { %747 = vmatprep.subr.mxu1 %v871_v0 }
 0x100   :  { %748 = vmatpush3.msra.mxu1 %v319_v60 }
 0x101   :  { %749 = vmatprep.subr.mxu1 %v871_v0 }
 0x102   :  { %750 = vmatpush3.msra.mxu1 %v318_v61 }
 0x103   :  { %751 = vmatprep.subr.mxu1 %v871_v0 }
 0x104   :  { %752 = vmatpush3.msra.mxu1 %v317_v62 }
 0x105   :  { %753 = vmatprep.subr.mxu1 %v871_v0 }
 0x106   :  { %754 = vmatpush3.msra.mxu1 %v316_v63 }
 0x107   :  { %755 = vmatprep.subr.mxu1 %v871_v0 }
 0x108   :  { %756 = vmatpush3.msra.mxu1 %v315_v1 }
 0x109   :  { %757 = vmatprep.subr.mxu1 %v871_v0 }
 0x10a   :  { %758 = vmatpush3.msra.mxu1 %v314_v2 }
 0x10b   :  { %759 = vmatprep.subr.mxu1 %v871_v0 }
 0x10c   :  { %760 = vmatpush3.msra.mxu1 %v313_v3 }
 0x10d   :  { %761 = vmatprep.subr.mxu1 %v871_v0 }
 0x10e   :  { %762 = vmatpush3.msra.mxu1 %v312_v4 }
 0x10f   :  { %763 = vmatprep.subr.mxu1 %v871_v0 }
 0x110   :  { %764 = vmatpush3.msra.mxu1 %v311_v10 }
 0x111   :  { %765 = vmatprep.subr.mxu1 %v871_v0 }
 0x112   :  { %766 = vmatpush3.msra.mxu1 %v310_v11 }
 0x113   :  { %767 = vmatprep.subr.mxu1 %v871_v0 }
 0x114   :  { %768 = vmatpush3.msra.mxu1 %v309_v12 }
 0x1b5   :  { %v210_v6 = vpop.f32.mrf.mxu1 }
 0x1b6   :  { %v211_v7 = vadd.f32 %v543_v5, %v210_v6 }
 0x1b7   :  { %v701_v8 = vpop.f32.mrf.mxu1 }
 0x1b8   :  { %v214_v9 = vmax.f32 %v211_v7, 0.0 }
 0x1ba   :  { %735 = vmatmul.mubr.f32.vlgmr.msra.gmra.mxu0 %v214_v9 }
 0x1bb   :  { %804 = vmatprep.mubr.msk.f32.mxu0 %vm872_vm0, %v871_v0  ;;  %773 = vmatpush3.msra.mxu0 %v417_v13 }
 0x1bc   :  { %774 = vmatprep.subr.mxu0 %v871_v0 }
 0x1bd   :  { %775 = vmatpush3.msra.mxu0 %v416_v14 }
 0x1be   :  { %776 = vmatprep.subr.mxu0 %v871_v0 }
 0x1bf   :  { %777 = vmatpush3.msra.mxu0 %v415_v15 }
 0x1c0   :  { %778 = vmatprep.subr.mxu0 %v871_v0 }
 0x1c1   :  { %779 = vmatpush3.msra.mxu0 %v414_v16 }
 0x1c2   :  { %780 = vmatprep.subr.mxu0 %v871_v0 }
 0x1c3   :  { %781 = vmatpush3.msra.mxu0 %v413_v17 }
 0x1c4   :  { %782 = vmatprep.subr.mxu0 %v871_v0 }
 0x1c5   :  { %783 = vmatpush3.msra.mxu0 %v412_v18 }
 0x1c6   :  { %784 = vmatprep.subr.mxu0 %v871_v0 }
 0x1c7   :  { %785 = vmatpush3.msra.mxu0 %v411_v19 }
 0x1c8   :  { %786 = vmatprep.subr.mxu0 %v871_v0 }
 0x1c9   :  { %787 = vmatpush3.msra.mxu0 %v410_v20 }
 0x1ca   :  { %788 = vmatprep.subr.mxu0 %v871_v0 }
 0x1cb   :  { %789 = vmatpush3.msra.mxu0 %v409_v21 }
 0x1cc   :  { %790 = vmatprep.subr.mxu0 %v871_v0 }
 0x1cd   :  { %791 = vmatpush3.msra.mxu0 %v408_v22 }
 0x1ce   :  { %792 = vmatprep.subr.mxu0 %v871_v0 }
 0x1cf   :  { %793 = vmatpush3.msra.mxu0 %v407_v23 }
 0x1d0   :  { %794 = vmatprep.subr.mxu0 %v871_v0 }
 0x1d1   :  { %795 = vmatpush3.msra.mxu0 %v406_v24 }
 0x1d2   :  { %796 = vmatprep.subr.mxu0 %v871_v0 }
 0x1d3   :  { %797 = vmatpush3.msra.mxu0 %v405_v25 }
 0x1d4   :  { %798 = vmatprep.subr.mxu0 %v871_v0 }
 0x1d5   :  { %799 = vmatpush3.msra.mxu0 %v404_v31 }
 0x1d6   :  { %800 = vmatprep.subr.mxu0 %v871_v0 }
 0x1d7   :  { %801 = vmatpush3.msra.mxu0 %v403_v32 }
 0x1d8   :  { %802 = vmatprep.subr.mxu0 %v871_v0 }
 0x1d9   :  { %803 = vmatpush3.msra.mxu0 %v402_v33 }
 0x27a   :  { %v303_v27 = vpop.f32.mrf.mxu0 }
 0x27b   :  { %v304_v28 = vadd.f32 %v544_v26, %v303_v27 }
 0x27c   :  { %v736_v29 = vpop.f32.mrf.mxu0 }
 0x27d   :  { %v307_v30 = vmax.f32 %v304_v28, 0.0 }
 0x27f   :  { %770 = vmatmul.mubr.f32.vlgmr.msra.gmra.mxu1 %v307_v30 }
 0x33f   :  { %v396_v35 = vpop.f32.mrf.mxu1 }
 0x340   :  { %v397_v36 = vadd.f32 %v545_v34, %v396_v35 }
 0x341   :  { %v771_v37 = vpop.f32.mrf.mxu1 }
 0x342   :  { %v400_v38 = vmax.f32 %v397_v36, 0.0 }
 0x344   :  { %805 = vmatmul.mubr.f32.vlgmr.msra.gmra.mxu0 %v400_v38 }
 0x404   :  { %v489_v40 = vpop.f32.mrf.mxu0 }
 0x405   :  { %v490_v41 = vadd.f32 %v546_v39, %v489_v40 }
 0x406   :  { %v806_v42 = vpop.f32.mrf.mxu0 }
 0x407   :  { %494 = vrot.lane.b32.xlu0 %v490_v41, %s873_s29 }
 0x479   :  { %v495_v0 = vpop.permute.xlu0 %494 }
 0x47a   :  { %v497_v43 = vmax.f32 %v490_v41, %v495_v0 }
 0x47c   :  { %502 = vrot.lane.b32.xlu0 %v497_v43, %s874_s30  ;;  %v498_v49 = vsub.f32 %v490_v41, %v497_v43 }
 0x47e   :  { %v499_v50 = vmul.f32 1.442695, %v498_v49 }
 0x4ee   :  { %v503_v44 = vpop.permute.xlu0 %502 }
 0x4ef   :  { %v505_v45 = vsub.f32 %v490_v41, %v503_v44 }
 0x4f1   :  { %v506_v46 = vmul.f32 1.442695, %v505_v45 }
 0x4f3   :  { %818 = vpow2.f32 %v506_v46 }
 0x4f4   :  { %820 = vpow2.f32 %v499_v50 }
 0x500   :  { %v819_v47 = vpop.eup %818 }
 0x501   :  { %509 = vrot.lane.b32.xlu1 %v819_v47, %s873_s29  ;;  %v821_v51 = vpop.eup %820 }
 0x573   :  { %v510_v52 = vpop.permute.xlu1 %509 }
 0x574   :  { %v512_v53 = vadd.f32 %v821_v51, %v510_v52 }
 0x576   :  { %822 = vlog2.f32 %v512_v53 }
 0x583   :  { %v823_v54 = vpop.eup %822 }
 0x584   :  { %v514_v55 = vmul.f32 0.6931472, %v823_v54 }
 0x586   :  { %v515_v56 = vadd.f32 %v514_v55, %v497_v43 }
 0x588   :  { %521 = vperm.xlu1 %816, %v515_v56  }
 0x603   :  { %v522_v59 = vpop.permute.xlu1 %521 }
 0x604   :  { %v524_v60 = vsel %vm518_vm1, %v522_v59, 0.0 }
 0x605   :  { %v525_v61 = vsub.f32 %v490_v41, %v524_v60 }
 0x607   :  { %526 = vst [vmem:[#allocation5] sm:$0xff] %v525_v61 }
 0x608   :  { %855 = shalt.err (!%p852_p9)
}
 0x609   :  { %536 = dma.vmem_to_hbm [thread:$0]  %s534_s4, 128, %s1014_s3, [#allocation4]  }
 0x60a   :  { %866 = dma.done.wait [#allocation4], 128  }
 0x60b   :  { %867 = vsyncadd [#allocation4], 4294967168 }
 0x60c   :  { %540 = vsyncpa [#allocation3], 1 }
 0x60d   :  { %541 = vsyncpa [#allocation4], 1 }

</bundles_post_ra>
